<compile_context>
chip_gen: v5e
topology: v5e:2x2
jax: 0.10.0
libtpu: 0.0.40
codegen_flags: <defaults>
</compile_context>

<pallas_src>
import jax
import jax.numpy as jnp
from jax import lax
from jax.experimental import pallas as pl
from jax.experimental.pallas import tpu as pltpu


def _bert_embed_kernel(seq_sm,        # (B*L,) int32 token ids in SMEM (prefetch)
                       seg_ref,       # (1, TL, 1) int32 segment ids (VMEM)
                       seg_tab_ref,   # (S, D)  f32 segment table (VMEM)
                       pos_ref,       # (TL, D) f32 position rows for this tile
                       tok_hbm,       # (V, D)  f32 token table, left in HBM
                       out_ref,       # (1, TL, D) f32
                       gbuf,          # (2, TL, D) f32 VMEM gather double-buffer
                       sems):         # (2,) DMA semaphores, one per slot
    _, TL, D = gbuf.shape
    S = seg_tab_ref.shape[0]
    l = pl.program_id(0)              # sequence-tile index (outer, parallel)
    b = pl.program_id(1)              # batch index         (inner, arbitrary)
    B = pl.num_programs(1)
    L = pl.num_programs(0) * TL
    slot = lax.rem(b, 2)

    def start_gather(bb, sl):
        """Issue TL single-row DMAs for batch element bb into gbuf[sl]."""
        base = bb * L + l * TL        # flat index of this tile's first token

        def issue(j):
            tid = seq_sm[base + j]
            pltpu.make_async_copy(
                tok_hbm.at[pl.ds(tid, 1), :],
                gbuf.at[sl, pl.ds(j, 1), :],
                sems.at[sl],
            ).start()

        if TL <= 128:                 # small tile: fully unrolled issue loop
            for j in range(TL):
                issue(j)
        else:                         # big tile: cap code size

            def body(j, carry):
                issue(j)
                return carry

            lax.fori_loop(0, TL, body, 0, unroll=8)

    # --- prime the pipeline on the first batch element of this l-chain ------
    @pl.when(b == 0)
    def _():
        start_gather(0, 0)

    # --- prefetch the NEXT batch element's rows.  Ids are read from SMEM
    #     BEFORE the wait below (wait breaks sst->sld forwarding). ------------
    @pl.when(b + 1 < B)
    def _():
        start_gather(b + 1, 1 - slot)

    # --- segment + position embedding on the VPU while the DMAs fly ---------
    seg_ids = seg_ref[0]                                  # (TL, 1) int32
    if S == 2:
        row0 = seg_tab_ref[0][None, :]                    # hoisted broadcasts
        row1 = seg_tab_ref[1][None, :]
        seg_e = jnp.where(seg_ids == 1, row1, row0)
    else:
        rows = [seg_tab_ref[s][None, :] for s in range(S)]
        seg_e = jnp.broadcast_to(rows[0], (TL, D))
        for s in range(1, S):
            seg_e = jnp.where(seg_ids == s, rows[s], seg_e)
    # NOTE: out-of-range segment ids fall back to row 0 (PyTorch would raise).
    rest = seg_e + pos_ref[...]

    # --- single aggregated wait: the TL row copies each signalled D*4 bytes
    #     on sems[slot]; one (TL, D)-sized descriptor consumes them all. ------
    pltpu.make_async_copy(
        tok_hbm.at[pl.ds(0, TL), :], gbuf.at[slot], sems.at[slot]
    ).wait()

    out_ref[0] = gbuf[slot] + rest


def bert_embedding(seq, seg, tok_tab, seg_tab, pos_tab):
    """seq, seg: (B, L) integer ids.  Returns (B, L, D) float32."""
    B, L = seq.shape
    V, D = tok_tab.shape
    S, _ = seg_tab.shape
    max_len = pos_tab.shape[0]
    assert L == max_len, "forward adds pos_embed(arange(max_len)); needs L == max_len"
    assert L % 8 == 0, "sequence length must be a multiple of 8"

    # Sequence tile: largest multiple-of-8 divisor of L, capped at 512.
    # VMEM stays tiny (2 * TL * D * 4 bytes for the gather double-buffer).
    TL = 8
    for cand in range(8, min(L, 512) + 1, 8):
        if L % cand == 0:
            TL = cand
    assert V >= TL, "aggregated-wait descriptor requires vocab_size >= tile"

    seq_flat = seq.reshape(B * L).astype(jnp.int32)       # scalar prefetch (SMEM)
    seg3 = seg.astype(jnp.int32)[..., None]               # (B, L, 1) for VPU select

    grid = (L // TL, B)   # batch innermost -> pos block reused across batch

    return pl.pallas_call(
        _bert_embed_kernel,
        out_shape=jax.ShapeDtypeStruct((B, L, D), jnp.float32),
        grid_spec=pltpu.PrefetchScalarGridSpec(
            num_scalar_prefetch=1,
            grid=grid,
            in_specs=[
                pl.BlockSpec((1, TL, 1), lambda l, b, ids: (b, l, 0)),  # seg ids
                pl.BlockSpec((S, D), lambda l, b, ids: (0, 0)),         # seg table
                pl.BlockSpec((TL, D), lambda l, b, ids: (l, 0)),        # pos rows
                pl.BlockSpec(memory_space=pl.ANY),                      # tok table (HBM)
            ],
            out_specs=pl.BlockSpec((1, TL, D), lambda l, b, ids: (b, l, 0)),
            scratch_shapes=[
                pltpu.VMEM((2, TL, D), tok_tab.dtype),
                pltpu.SemaphoreType.DMA((2,)),
            ],
        ),
        compiler_params=pltpu.CompilerParams(
            # Inner (batch) axis is "arbitrary": the cross-step gather prefetch
            # relies on sequential order; outer sequence axis stays parallel.
            dimension_semantics=("parallel", "arbitrary")),
    )(seq_flat, seg3, seg_tab, pos_tab, tok_tab)


if __name__ == "__main__":
    # Small, deterministic configuration consistent with the module.
    vocab_size = 32
    n_segments = 2
    max_len = 8          # seq length L must equal max_len for the pos broadcast
    embed_dim = 128
    batch = 2
    # dropout = 0.1      # defined in __init__ but unused in forward
    # TODO(synk): nn.Dropout is never applied in forward(), so it is omitted.

    key = jax.random.PRNGKey(0)
    k_tok, k_seg, k_pos, k_ids, k_segids = jax.random.split(key, 5)

    tok_tab = jax.random.normal(k_tok, (vocab_size, embed_dim), jnp.float32)
    seg_tab = jax.random.normal(k_seg, (n_segments, embed_dim), jnp.float32)
    pos_tab = jax.random.normal(k_pos, (max_len, embed_dim), jnp.float32)

    seq = jax.random.randint(k_ids, (batch, max_len), 0, vocab_size, jnp.int32)
    seg = jax.random.randint(k_segids, (batch, max_len), 0, n_segments, jnp.int32)

    out = bert_embedding(seq, seg, tok_tab, seg_tab, pos_tab)
    out = jax.block_until_ready(out)

    # Pure-JAX reference (same semantics as the PyTorch forward).
    ref = tok_tab[seq] + seg_tab[seg] + pos_tab[None, :, :]
    assert out.shape == (batch, max_len, embed_dim)
    assert jnp.allclose(out, ref, atol=1e-5, rtol=1e-5)

    print("KERNEL_OK")
</pallas_src>

<mosaic_0001>
module attributes {stable_mosaic.version = 11 : i64} {
  func.func @_bert_embed_kernel(%arg0: i32, %arg1: i32, %arg2: memref<16xi32, #tpu.memory_space<smem>>, %arg3: memref<1x8x1xi32, #tpu.memory_space<vmem>>, %arg4: memref<2x128xf32, #tpu.memory_space<vmem>>, %arg5: memref<8x128xf32, #tpu.memory_space<vmem>>, %arg6: memref<32x128xf32, #tpu.memory_space<any>>, %arg7: memref<1x8x128xf32, #tpu.memory_space<vmem>>, %arg8: memref<2x8x128xf32, #tpu.memory_space<vmem>>, %arg9: memref<2x!tpu.dma_semaphore, #tpu.memory_space<semaphore_mem>>) attributes {dimension_semantics = [#tpu.dimension_semantics<parallel>, #tpu.dimension_semantics<arbitrary>], iteration_bounds = array<i64: 1, 2>, scalar_prefetch = 1 : i64, scratch_operands = 2 : i64, tpu.core_type = #tpu.core_type<tc>, window_params = [{transform_indices = @transform_0, window_bounds = array<i64: 1, 8, 1>}, {pipeline_mode = #tpu.pipeline_mode<synchronous>, transform_indices = @transform_1, window_bounds = array<i64: 2, 128>}, {transform_indices = @transform_2, window_bounds = array<i64: 8, 128>}, {}, {transform_indices = @transform_4, window_bounds = array<i64: 1, 8, 128>}]} {
    %c2_i32 = arith.constant 2 : i32
    %0 = arith.remsi %arg1, %c2_i32 : i32
    %c0_i32 = arith.constant 0 : i32
    %1 = arith.cmpi eq, %arg1, %c0_i32 : i32
    %2 = arith.extui %1 : i1 to i32
    %c0_i32_0 = arith.constant 0 : i32
    %3 = arith.cmpi ne, %2, %c0_i32_0 : i32
    scf.if %3 {
      %c8_i32 = arith.constant 8 : i32
      %39 = arith.muli %arg0, %c8_i32 : i32
      %c0_i32_20 = arith.constant 0 : i32
      %40 = arith.addi %c0_i32_20, %39 : i32
      %c0_i32_21 = arith.constant 0 : i32
      %41 = arith.addi %40, %c0_i32_21 : i32
      %42 = arith.index_cast %41 : i32 to index
      %43 = memref.load %arg2[%42] : memref<16xi32, #tpu.memory_space<smem>>
      %c0_i32_22 = arith.constant 0 : i32
      %c0_i32_23 = arith.constant 0 : i32
      %c0_i32_24 = arith.constant 0 : i32
      %44 = tpu.memref_slice %arg6[%43, %c0_i32_24] : memref<32x128xf32, #tpu.memory_space<any>> -> memref<1x128xf32, #tpu.memory_space<any>>
      %c0_i32_25 = arith.constant 0 : i32
      %c0_i32_26 = arith.constant 0 : i32
      %45 = tpu.memref_slice %arg8[%c0_i32_22, %c0_i32_25, %c0_i32_26] : memref<2x8x128xf32, #tpu.memory_space<vmem>> -> memref<1x1x128xf32, #tpu.memory_space<vmem>>
      %46 = tpu.memref_squeeze %45 : memref<1x1x128xf32, #tpu.memory_space<vmem>> -> memref<1x128xf32, #tpu.memory_space<vmem>>
      %47 = tpu.memref_slice %arg9[%c0_i32_23] : memref<2x!tpu.dma_semaphore, #tpu.memory_space<semaphore_mem>> -> memref<1x!tpu.dma_semaphore, #tpu.memory_space<semaphore_mem>>
      %48 = tpu.memref_squeeze %47 : memref<1x!tpu.dma_semaphore, #tpu.memory_space<semaphore_mem>> -> memref<!tpu.dma_semaphore, #tpu.memory_space<semaphore_mem>>
      tpu.enqueue_dma source(%44 : memref<1x128xf32, #tpu.memory_space<any>>) target(%46 : memref<1x128xf32, #tpu.memory_space<vmem>>) target_semaphore(%48 : memref<!tpu.dma_semaphore, #tpu.memory_space<semaphore_mem>>)
      %c1_i32_27 = arith.constant 1 : i32
      %49 = arith.addi %40, %c1_i32_27 : i32
      %50 = arith.index_cast %49 : i32 to index
      %51 = memref.load %arg2[%50] : memref<16xi32, #tpu.memory_space<smem>>
      %c0_i32_28 = arith.constant 0 : i32
      %c0_i32_29 = arith.constant 0 : i32
      %c0_i32_30 = arith.constant 0 : i32
      %52 = tpu.memref_slice %arg6[%51, %c0_i32_30] : memref<32x128xf32, #tpu.memory_space<any>> -> memref<1x128xf32, #tpu.memory_space<any>>
      %c1_i32_31 = arith.constant 1 : i32
      %c0_i32_32 = arith.constant 0 : i32
      %53 = tpu.memref_slice %arg8[%c0_i32_28, %c1_i32_31, %c0_i32_32] : memref<2x8x128xf32, #tpu.memory_space<vmem>> -> memref<1x1x128xf32, #tpu.memory_space<vmem>>
      %54 = tpu.memref_squeeze %53 : memref<1x1x128xf32, #tpu.memory_space<vmem>> -> memref<1x128xf32, #tpu.memory_space<vmem>>
      %55 = tpu.memref_slice %arg9[%c0_i32_29] : memref<2x!tpu.dma_semaphore, #tpu.memory_space<semaphore_mem>> -> memref<1x!tpu.dma_semaphore, #tpu.memory_space<semaphore_mem>>
      %56 = tpu.memref_squeeze %55 : memref<1x!tpu.dma_semaphore, #tpu.memory_space<semaphore_mem>> -> memref<!tpu.dma_semaphore, #tpu.memory_space<semaphore_mem>>
      tpu.enqueue_dma source(%52 : memref<1x128xf32, #tpu.memory_space<any>>) target(%54 : memref<1x128xf32, #tpu.memory_space<vmem>>) target_semaphore(%56 : memref<!tpu.dma_semaphore, #tpu.memory_space<semaphore_mem>>)
      %c2_i32_33 = arith.constant 2 : i32
      %57 = arith.addi %40, %c2_i32_33 : i32
      %58 = arith.index_cast %57 : i32 to index
      %59 = memref.load %arg2[%58] : memref<16xi32, #tpu.memory_space<smem>>
      %c0_i32_34 = arith.constant 0 : i32
      %c0_i32_35 = arith.constant 0 : i32
      %c0_i32_36 = arith.constant 0 : i32
      %60 = tpu.memref_slice %arg6[%59, %c0_i32_36] : memref<32x128xf32, #tpu.memory_space<any>> -> memref<1x128xf32, #tpu.memory_space<any>>
      %c2_i32_37 = arith.constant 2 : i32
      %c0_i32_38 = arith.constant 0 : i32
      %61 = tpu.memref_slice %arg8[%c0_i32_34, %c2_i32_37, %c0_i32_38] : memref<2x8x128xf32, #tpu.memory_space<vmem>> -> memref<1x1x128xf32, #tpu.memory_space<vmem>>
      %62 = tpu.memref_squeeze %61 : memref<1x1x128xf32, #tpu.memory_space<vmem>> -> memref<1x128xf32, #tpu.memory_space<vmem>>
      %63 = tpu.memref_slice %arg9[%c0_i32_35] : memref<2x!tpu.dma_semaphore, #tpu.memory_space<semaphore_mem>> -> memref<1x!tpu.dma_semaphore, #tpu.memory_space<semaphore_mem>>
      %64 = tpu.memref_squeeze %63 : memref<1x!tpu.dma_semaphore, #tpu.memory_space<semaphore_mem>> -> memref<!tpu.dma_semaphore, #tpu.memory_space<semaphore_mem>>
      tpu.enqueue_dma source(%60 : memref<1x128xf32, #tpu.memory_space<any>>) target(%62 : memref<1x128xf32, #tpu.memory_space<vmem>>) target_semaphore(%64 : memref<!tpu.dma_semaphore, #tpu.memory_space<semaphore_mem>>)
      %c3_i32 = arith.constant 3 : i32
      %65 = arith.addi %40, %c3_i32 : i32
      %66 = arith.index_cast %65 : i32 to index
      %67 = memref.load %arg2[%66] : memref<16xi32, #tpu.memory_space<smem>>
      %c0_i32_39 = arith.constant 0 : i32
      %c0_i32_40 = arith.constant 0 : i32
      %c0_i32_41 = arith.constant 0 : i32
      %68 = tpu.memref_slice %arg6[%67, %c0_i32_41] : memref<32x128xf32, #tpu.memory_space<any>> -> memref<1x128xf32, #tpu.memory_space<any>>
      %c3_i32_42 = arith.constant 3 : i32
      %c0_i32_43 = arith.constant 0 : i32
      %69 = tpu.memref_slice %arg8[%c0_i32_39, %c3_i32_42, %c0_i32_43] : memref<2x8x128xf32, #tpu.memory_space<vmem>> -> memref<1x1x128xf32, #tpu.memory_space<vmem>>
      %70 = tpu.memref_squeeze %69 : memref<1x1x128xf32, #tpu.memory_space<vmem>> -> memref<1x128xf32, #tpu.memory_space<vmem>>
      %71 = tpu.memref_slice %arg9[%c0_i32_40] : memref<2x!tpu.dma_semaphore, #tpu.memory_space<semaphore_mem>> -> memref<1x!tpu.dma_semaphore, #tpu.memory_space<semaphore_mem>>
      %72 = tpu.memref_squeeze %71 : memref<1x!tpu.dma_semaphore, #tpu.memory_space<semaphore_mem>> -> memref<!tpu.dma_semaphore, #tpu.memory_space<semaphore_mem>>
      tpu.enqueue_dma source(%68 : memref<1x128xf32, #tpu.memory_space<any>>) target(%70 : memref<1x128xf32, #tpu.memory_space<vmem>>) target_semaphore(%72 : memref<!tpu.dma_semaphore, #tpu.memory_space<semaphore_mem>>)
      %c4_i32 = arith.constant 4 : i32
      %73 = arith.addi %40, %c4_i32 : i32
      %74 = arith.index_cast %73 : i32 to index
      %75 = memref.load %arg2[%74] : memref<16xi32, #tpu.memory_space<smem>>
      %c0_i32_44 = arith.constant 0 : i32
      %c0_i32_45 = arith.constant 0 : i32
      %c0_i32_46 = arith.constant 0 : i32
      %76 = tpu.memref_slice %arg6[%75, %c0_i32_46] : memref<32x128xf32, #tpu.memory_space<any>> -> memref<1x128xf32, #tpu.memory_space<any>>
      %c4_i32_47 = arith.constant 4 : i32
      %c0_i32_48 = arith.constant 0 : i32
      %77 = tpu.memref_slice %arg8[%c0_i32_44, %c4_i32_47, %c0_i32_48] : memref<2x8x128xf32, #tpu.memory_space<vmem>> -> memref<1x1x128xf32, #tpu.memory_space<vmem>>
      %78 = tpu.memref_squeeze %77 : memref<1x1x128xf32, #tpu.memory_space<vmem>> -> memref<1x128xf32, #tpu.memory_space<vmem>>
      %79 = tpu.memref_slice %arg9[%c0_i32_45] : memref<2x!tpu.dma_semaphore, #tpu.memory_space<semaphore_mem>> -> memref<1x!tpu.dma_semaphore, #tpu.memory_space<semaphore_mem>>
      %80 = tpu.memref_squeeze %79 : memref<1x!tpu.dma_semaphore, #tpu.memory_space<semaphore_mem>> -> memref<!tpu.dma_semaphore, #tpu.memory_space<semaphore_mem>>
      tpu.enqueue_dma source(%76 : memref<1x128xf32, #tpu.memory_space<any>>) target(%78 : memref<1x128xf32, #tpu.memory_space<vmem>>) target_semaphore(%80 : memref<!tpu.dma_semaphore, #tpu.memory_space<semaphore_mem>>)
      %c5_i32 = arith.constant 5 : i32
      %81 = arith.addi %40, %c5_i32 : i32
      %82 = arith.index_cast %81 : i32 to index
      %83 = memref.load %arg2[%82] : memref<16xi32, #tpu.memory_space<smem>>
      %c0_i32_49 = arith.constant 0 : i32
      %c0_i32_50 = arith.constant 0 : i32
      %c0_i32_51 = arith.constant 0 : i32
      %84 = tpu.memref_slice %arg6[%83, %c0_i32_51] : memref<32x128xf32, #tpu.memory_space<any>> -> memref<1x128xf32, #tpu.memory_space<any>>
      %c5_i32_52 = arith.constant 5 : i32
      %c0_i32_53 = arith.constant 0 : i32
      %85 = tpu.memref_slice %arg8[%c0_i32_49, %c5_i32_52, %c0_i32_53] : memref<2x8x128xf32, #tpu.memory_space<vmem>> -> memref<1x1x128xf32, #tpu.memory_space<vmem>>
      %86 = tpu.memref_squeeze %85 : memref<1x1x128xf32, #tpu.memory_space<vmem>> -> memref<1x128xf32, #tpu.memory_space<vmem>>
      %87 = tpu.memref_slice %arg9[%c0_i32_50] : memref<2x!tpu.dma_semaphore, #tpu.memory_space<semaphore_mem>> -> memref<1x!tpu.dma_semaphore, #tpu.memory_space<semaphore_mem>>
      %88 = tpu.memref_squeeze %87 : memref<1x!tpu.dma_semaphore, #tpu.memory_space<semaphore_mem>> -> memref<!tpu.dma_semaphore, #tpu.memory_space<semaphore_mem>>
      tpu.enqueue_dma source(%84 : memref<1x128xf32, #tpu.memory_space<any>>) target(%86 : memref<1x128xf32, #tpu.memory_space<vmem>>) target_semaphore(%88 : memref<!tpu.dma_semaphore, #tpu.memory_space<semaphore_mem>>)
      %c6_i32 = arith.constant 6 : i32
      %89 = arith.addi %40, %c6_i32 : i32
      %90 = arith.index_cast %89 : i32 to index
      %91 = memref.load %arg2[%90] : memref<16xi32, #tpu.memory_space<smem>>
      %c0_i32_54 = arith.constant 0 : i32
      %c0_i32_55 = arith.constant 0 : i32
      %c0_i32_56 = arith.constant 0 : i32
      %92 = tpu.memref_slice %arg6[%91, %c0_i32_56] : memref<32x128xf32, #tpu.memory_space<any>> -> memref<1x128xf32, #tpu.memory_space<any>>
      %c6_i32_57 = arith.constant 6 : i32
      %c0_i32_58 = arith.constant 0 : i32
      %93 = tpu.memref_slice %arg8[%c0_i32_54, %c6_i32_57, %c0_i32_58] : memref<2x8x128xf32, #tpu.memory_space<vmem>> -> memref<1x1x128xf32, #tpu.memory_space<vmem>>
      %94 = tpu.memref_squeeze %93 : memref<1x1x128xf32, #tpu.memory_space<vmem>> -> memref<1x128xf32, #tpu.memory_space<vmem>>
      %95 = tpu.memref_slice %arg9[%c0_i32_55] : memref<2x!tpu.dma_semaphore, #tpu.memory_space<semaphore_mem>> -> memref<1x!tpu.dma_semaphore, #tpu.memory_space<semaphore_mem>>
      %96 = tpu.memref_squeeze %95 : memref<1x!tpu.dma_semaphore, #tpu.memory_space<semaphore_mem>> -> memref<!tpu.dma_semaphore, #tpu.memory_space<semaphore_mem>>
      tpu.enqueue_dma source(%92 : memref<1x128xf32, #tpu.memory_space<any>>) target(%94 : memref<1x128xf32, #tpu.memory_space<vmem>>) target_semaphore(%96 : memref<!tpu.dma_semaphore, #tpu.memory_space<semaphore_mem>>)
      %c7_i32 = arith.constant 7 : i32
      %97 = arith.addi %40, %c7_i32 : i32
      %98 = arith.index_cast %97 : i32 to index
      %99 = memref.load %arg2[%98] : memref<16xi32, #tpu.memory_space<smem>>
      %c0_i32_59 = arith.constant 0 : i32
      %c0_i32_60 = arith.constant 0 : i32
      %c0_i32_61 = arith.constant 0 : i32
      %100 = tpu.memref_slice %arg6[%99, %c0_i32_61] : memref<32x128xf32, #tpu.memory_space<any>> -> memref<1x128xf32, #tpu.memory_space<any>>
      %c7_i32_62 = arith.constant 7 : i32
      %c0_i32_63 = arith.constant 0 : i32
      %101 = tpu.memref_slice %arg8[%c0_i32_59, %c7_i32_62, %c0_i32_63] : memref<2x8x128xf32, #tpu.memory_space<vmem>> -> memref<1x1x128xf32, #tpu.memory_space<vmem>>
      %102 = tpu.memref_squeeze %101 : memref<1x1x128xf32, #tpu.memory_space<vmem>> -> memref<1x128xf32, #tpu.memory_space<vmem>>
      %103 = tpu.memref_slice %arg9[%c0_i32_60] : memref<2x!tpu.dma_semaphore, #tpu.memory_space<semaphore_mem>> -> memref<1x!tpu.dma_semaphore, #tpu.memory_space<semaphore_mem>>
      %104 = tpu.memref_squeeze %103 : memref<1x!tpu.dma_semaphore, #tpu.memory_space<semaphore_mem>> -> memref<!tpu.dma_semaphore, #tpu.memory_space<semaphore_mem>>
      tpu.enqueue_dma source(%100 : memref<1x128xf32, #tpu.memory_space<any>>) target(%102 : memref<1x128xf32, #tpu.memory_space<vmem>>) target_semaphore(%104 : memref<!tpu.dma_semaphore, #tpu.memory_space<semaphore_mem>>)
    } else {
    }
    %c1_i32 = arith.constant 1 : i32
    %4 = arith.addi %arg1, %c1_i32 : i32
    %c2_i32_1 = arith.constant 2 : i32
    %5 = arith.cmpi slt, %4, %c2_i32_1 : i32
    %6 = arith.extui %5 : i1 to i32
    %c0_i32_2 = arith.constant 0 : i32
    %7 = arith.cmpi ne, %6, %c0_i32_2 : i32
    scf.if %7 {
      %c1_i32_20 = arith.constant 1 : i32
      %39 = arith.addi %arg1, %c1_i32_20 : i32
      %c1_i32_21 = arith.constant 1 : i32
      %40 = arith.subi %c1_i32_21, %0 : i32
      %c8_i32 = arith.constant 8 : i32
      %41 = arith.muli %39, %c8_i32 : i32
      %c8_i32_22 = arith.constant 8 : i32
      %42 = arith.muli %arg0, %c8_i32_22 : i32
      %43 = arith.addi %41, %42 : i32
      %c0_i32_23 = arith.constant 0 : i32
      %44 = arith.addi %43, %c0_i32_23 : i32
      %45 = arith.index_cast %44 : i32 to index
      %46 = memref.load %arg2[%45] : memref<16xi32, #tpu.memory_space<smem>>
      %c0_i32_24 = arith.constant 0 : i32
      %47 = tpu.memref_slice %arg6[%46, %c0_i32_24] : memref<32x128xf32, #tpu.memory_space<any>> -> memref<1x128xf32, #tpu.memory_space<any>>
      %c0_i32_25 = arith.constant 0 : i32
      %c0_i32_26 = arith.constant 0 : i32
      %48 = tpu.memref_slice %arg8[%40, %c0_i32_25, %c0_i32_26] : memref<2x8x128xf32, #tpu.memory_space<vmem>> -> memref<1x1x128xf32, #tpu.memory_space<vmem>>
      %49 = tpu.memref_squeeze %48 : memref<1x1x128xf32, #tpu.memory_space<vmem>> -> memref<1x128xf32, #tpu.memory_space<vmem>>
      %50 = tpu.memref_slice %arg9[%40] : memref<2x!tpu.dma_semaphore, #tpu.memory_space<semaphore_mem>> -> memref<1x!tpu.dma_semaphore, #tpu.memory_space<semaphore_mem>>
      %51 = tpu.memref_squeeze %50 : memref<1x!tpu.dma_semaphore, #tpu.memory_space<semaphore_mem>> -> memref<!tpu.dma_semaphore, #tpu.memory_space<semaphore_mem>>
      tpu.enqueue_dma source(%47 : memref<1x128xf32, #tpu.memory_space<any>>) target(%49 : memref<1x128xf32, #tpu.memory_space<vmem>>) target_semaphore(%51 : memref<!tpu.dma_semaphore, #tpu.memory_space<semaphore_mem>>)
      %c1_i32_27 = arith.constant 1 : i32
      %52 = arith.addi %43, %c1_i32_27 : i32
      %53 = arith.index_cast %52 : i32 to index
      %54 = memref.load %arg2[%53] : memref<16xi32, #tpu.memory_space<smem>>
      %c0_i32_28 = arith.constant 0 : i32
      %55 = tpu.memref_slice %arg6[%54, %c0_i32_28] : memref<32x128xf32, #tpu.memory_space<any>> -> memref<1x128xf32, #tpu.memory_space<any>>
      %c1_i32_29 = arith.constant 1 : i32
      %c0_i32_30 = arith.constant 0 : i32
      %56 = tpu.memref_slice %arg8[%40, %c1_i32_29, %c0_i32_30] : memref<2x8x128xf32, #tpu.memory_space<vmem>> -> memref<1x1x128xf32, #tpu.memory_space<vmem>>
      %57 = tpu.memref_squeeze %56 : memref<1x1x128xf32, #tpu.memory_space<vmem>> -> memref<1x128xf32, #tpu.memory_space<vmem>>
      %58 = tpu.memref_slice %arg9[%40] : memref<2x!tpu.dma_semaphore, #tpu.memory_space<semaphore_mem>> -> memref<1x!tpu.dma_semaphore, #tpu.memory_space<semaphore_mem>>
      %59 = tpu.memref_squeeze %58 : memref<1x!tpu.dma_semaphore, #tpu.memory_space<semaphore_mem>> -> memref<!tpu.dma_semaphore, #tpu.memory_space<semaphore_mem>>
      tpu.enqueue_dma source(%55 : memref<1x128xf32, #tpu.memory_space<any>>) target(%57 : memref<1x128xf32, #tpu.memory_space<vmem>>) target_semaphore(%59 : memref<!tpu.dma_semaphore, #tpu.memory_space<semaphore_mem>>)
      %c2_i32_31 = arith.constant 2 : i32
      %60 = arith.addi %43, %c2_i32_31 : i32
      %61 = arith.index_cast %60 : i32 to index
      %62 = memref.load %arg2[%61] : memref<16xi32, #tpu.memory_space<smem>>
      %c0_i32_32 = arith.constant 0 : i32
      %63 = tpu.memref_slice %arg6[%62, %c0_i32_32] : memref<32x128xf32, #tpu.memory_space<any>> -> memref<1x128xf32, #tpu.memory_space<any>>
      %c2_i32_33 = arith.constant 2 : i32
      %c0_i32_34 = arith.constant 0 : i32
      %64 = tpu.memref_slice %arg8[%40, %c2_i32_33, %c0_i32_34] : memref<2x8x128xf32, #tpu.memory_space<vmem>> -> memref<1x1x128xf32, #tpu.memory_space<vmem>>
      %65 = tpu.memref_squeeze %64 : memref<1x1x128xf32, #tpu.memory_space<vmem>> -> memref<1x128xf32, #tpu.memory_space<vmem>>
      %66 = tpu.memref_slice %arg9[%40] : memref<2x!tpu.dma_semaphore, #tpu.memory_space<semaphore_mem>> -> memref<1x!tpu.dma_semaphore, #tpu.memory_space<semaphore_mem>>
      %67 = tpu.memref_squeeze %66 : memref<1x!tpu.dma_semaphore, #tpu.memory_space<semaphore_mem>> -> memref<!tpu.dma_semaphore, #tpu.memory_space<semaphore_mem>>
      tpu.enqueue_dma source(%63 : memref<1x128xf32, #tpu.memory_space<any>>) target(%65 : memref<1x128xf32, #tpu.memory_space<vmem>>) target_semaphore(%67 : memref<!tpu.dma_semaphore, #tpu.memory_space<semaphore_mem>>)
      %c3_i32 = arith.constant 3 : i32
      %68 = arith.addi %43, %c3_i32 : i32
      %69 = arith.index_cast %68 : i32 to index
      %70 = memref.load %arg2[%69] : memref<16xi32, #tpu.memory_space<smem>>
      %c0_i32_35 = arith.constant 0 : i32
      %71 = tpu.memref_slice %arg6[%70, %c0_i32_35] : memref<32x128xf32, #tpu.memory_space<any>> -> memref<1x128xf32, #tpu.memory_space<any>>
      %c3_i32_36 = arith.constant 3 : i32
      %c0_i32_37 = arith.constant 0 : i32
      %72 = tpu.memref_slice %arg8[%40, %c3_i32_36, %c0_i32_37] : memref<2x8x128xf32, #tpu.memory_space<vmem>> -> memref<1x1x128xf32, #tpu.memory_space<vmem>>
      %73 = tpu.memref_squeeze %72 : memref<1x1x128xf32, #tpu.memory_space<vmem>> -> memref<1x128xf32, #tpu.memory_space<vmem>>
      %74 = tpu.memref_slice %arg9[%40] : memref<2x!tpu.dma_semaphore, #tpu.memory_space<semaphore_mem>> -> memref<1x!tpu.dma_semaphore, #tpu.memory_space<semaphore_mem>>
      %75 = tpu.memref_squeeze %74 : memref<1x!tpu.dma_semaphore, #tpu.memory_space<semaphore_mem>> -> memref<!tpu.dma_semaphore, #tpu.memory_space<semaphore_mem>>
      tpu.enqueue_dma source(%71 : memref<1x128xf32, #tpu.memory_space<any>>) target(%73 : memref<1x128xf32, #tpu.memory_space<vmem>>) target_semaphore(%75 : memref<!tpu.dma_semaphore, #tpu.memory_space<semaphore_mem>>)
      %c4_i32 = arith.constant 4 : i32
      %76 = arith.addi %43, %c4_i32 : i32
      %77 = arith.index_cast %76 : i32 to index
      %78 = memref.load %arg2[%77] : memref<16xi32, #tpu.memory_space<smem>>
      %c0_i32_38 = arith.constant 0 : i32
      %79 = tpu.memref_slice %arg6[%78, %c0_i32_38] : memref<32x128xf32, #tpu.memory_space<any>> -> memref<1x128xf32, #tpu.memory_space<any>>
      %c4_i32_39 = arith.constant 4 : i32
      %c0_i32_40 = arith.constant 0 : i32
      %80 = tpu.memref_slice %arg8[%40, %c4_i32_39, %c0_i32_40] : memref<2x8x128xf32, #tpu.memory_space<vmem>> -> memref<1x1x128xf32, #tpu.memory_space<vmem>>
      %81 = tpu.memref_squeeze %80 : memref<1x1x128xf32, #tpu.memory_space<vmem>> -> memref<1x128xf32, #tpu.memory_space<vmem>>
      %82 = tpu.memref_slice %arg9[%40] : memref<2x!tpu.dma_semaphore, #tpu.memory_space<semaphore_mem>> -> memref<1x!tpu.dma_semaphore, #tpu.memory_space<semaphore_mem>>
      %83 = tpu.memref_squeeze %82 : memref<1x!tpu.dma_semaphore, #tpu.memory_space<semaphore_mem>> -> memref<!tpu.dma_semaphore, #tpu.memory_space<semaphore_mem>>
      tpu.enqueue_dma source(%79 : memref<1x128xf32, #tpu.memory_space<any>>) target(%81 : memref<1x128xf32, #tpu.memory_space<vmem>>) target_semaphore(%83 : memref<!tpu.dma_semaphore, #tpu.memory_space<semaphore_mem>>)
      %c5_i32 = arith.constant 5 : i32
      %84 = arith.addi %43, %c5_i32 : i32
      %85 = arith.index_cast %84 : i32 to index
      %86 = memref.load %arg2[%85] : memref<16xi32, #tpu.memory_space<smem>>
      %c0_i32_41 = arith.constant 0 : i32
      %87 = tpu.memref_slice %arg6[%86, %c0_i32_41] : memref<32x128xf32, #tpu.memory_space<any>> -> memref<1x128xf32, #tpu.memory_space<any>>
      %c5_i32_42 = arith.constant 5 : i32
      %c0_i32_43 = arith.constant 0 : i32
      %88 = tpu.memref_slice %arg8[%40, %c5_i32_42, %c0_i32_43] : memref<2x8x128xf32, #tpu.memory_space<vmem>> -> memref<1x1x128xf32, #tpu.memory_space<vmem>>
      %89 = tpu.memref_squeeze %88 : memref<1x1x128xf32, #tpu.memory_space<vmem>> -> memref<1x128xf32, #tpu.memory_space<vmem>>
      %90 = tpu.memref_slice %arg9[%40] : memref<2x!tpu.dma_semaphore, #tpu.memory_space<semaphore_mem>> -> memref<1x!tpu.dma_semaphore, #tpu.memory_space<semaphore_mem>>
      %91 = tpu.memref_squeeze %90 : memref<1x!tpu.dma_semaphore, #tpu.memory_space<semaphore_mem>> -> memref<!tpu.dma_semaphore, #tpu.memory_space<semaphore_mem>>
      tpu.enqueue_dma source(%87 : memref<1x128xf32, #tpu.memory_space<any>>) target(%89 : memref<1x128xf32, #tpu.memory_space<vmem>>) target_semaphore(%91 : memref<!tpu.dma_semaphore, #tpu.memory_space<semaphore_mem>>)
      %c6_i32 = arith.constant 6 : i32
      %92 = arith.addi %43, %c6_i32 : i32
      %93 = arith.index_cast %92 : i32 to index
      %94 = memref.load %arg2[%93] : memref<16xi32, #tpu.memory_space<smem>>
      %c0_i32_44 = arith.constant 0 : i32
      %95 = tpu.memref_slice %arg6[%94, %c0_i32_44] : memref<32x128xf32, #tpu.memory_space<any>> -> memref<1x128xf32, #tpu.memory_space<any>>
      %c6_i32_45 = arith.constant 6 : i32
      %c0_i32_46 = arith.constant 0 : i32
      %96 = tpu.memref_slice %arg8[%40, %c6_i32_45, %c0_i32_46] : memref<2x8x128xf32, #tpu.memory_space<vmem>> -> memref<1x1x128xf32, #tpu.memory_space<vmem>>
      %97 = tpu.memref_squeeze %96 : memref<1x1x128xf32, #tpu.memory_space<vmem>> -> memref<1x128xf32, #tpu.memory_space<vmem>>
      %98 = tpu.memref_slice %arg9[%40] : memref<2x!tpu.dma_semaphore, #tpu.memory_space<semaphore_mem>> -> memref<1x!tpu.dma_semaphore, #tpu.memory_space<semaphore_mem>>
      %99 = tpu.memref_squeeze %98 : memref<1x!tpu.dma_semaphore, #tpu.memory_space<semaphore_mem>> -> memref<!tpu.dma_semaphore, #tpu.memory_space<semaphore_mem>>
      tpu.enqueue_dma source(%95 : memref<1x128xf32, #tpu.memory_space<any>>) target(%97 : memref<1x128xf32, #tpu.memory_space<vmem>>) target_semaphore(%99 : memref<!tpu.dma_semaphore, #tpu.memory_space<semaphore_mem>>)
      %c7_i32 = arith.constant 7 : i32
      %100 = arith.addi %43, %c7_i32 : i32
      %101 = arith.index_cast %100 : i32 to index
      %102 = memref.load %arg2[%101] : memref<16xi32, #tpu.memory_space<smem>>
      %c0_i32_47 = arith.constant 0 : i32
      %103 = tpu.memref_slice %arg6[%102, %c0_i32_47] : memref<32x128xf32, #tpu.memory_space<any>> -> memref<1x128xf32, #tpu.memory_space<any>>
      %c7_i32_48 = arith.constant 7 : i32
      %c0_i32_49 = arith.constant 0 : i32
      %104 = tpu.memref_slice %arg8[%40, %c7_i32_48, %c0_i32_49] : memref<2x8x128xf32, #tpu.memory_space<vmem>> -> memref<1x1x128xf32, #tpu.memory_space<vmem>>
      %105 = tpu.memref_squeeze %104 : memref<1x1x128xf32, #tpu.memory_space<vmem>> -> memref<1x128xf32, #tpu.memory_space<vmem>>
      %106 = tpu.memref_slice %arg9[%40] : memref<2x!tpu.dma_semaphore, #tpu.memory_space<semaphore_mem>> -> memref<1x!tpu.dma_semaphore, #tpu.memory_space<semaphore_mem>>
      %107 = tpu.memref_squeeze %106 : memref<1x!tpu.dma_semaphore, #tpu.memory_space<semaphore_mem>> -> memref<!tpu.dma_semaphore, #tpu.memory_space<semaphore_mem>>
      tpu.enqueue_dma source(%103 : memref<1x128xf32, #tpu.memory_space<any>>) target(%105 : memref<1x128xf32, #tpu.memory_space<vmem>>) target_semaphore(%107 : memref<!tpu.dma_semaphore, #tpu.memory_space<semaphore_mem>>)
    } else {
    }
    %c0 = arith.constant 0 : index
    %c0_3 = arith.constant 0 : index
    %c0_4 = arith.constant 0 : index
    %8 = vector.load %arg3[%c0, %c0_3, %c0_4] : memref<1x8x1xi32, #tpu.memory_space<vmem>>, vector<1x8x1xi32>
    %9 = vector.shape_cast %8 : vector<1x8x1xi32> to vector<8x1xi32>
    %c0_5 = arith.constant 0 : index
    %c0_6 = arith.constant 0 : index
    %10 = vector.load %arg4[%c0_5, %c0_6] : memref<2x128xf32, #tpu.memory_space<vmem>>, vector<1x128xf32>
    %11 = vector.shape_cast %10 : vector<1x128xf32> to vector<128xf32>
    %12 = vector.shape_cast %11 : vector<128xf32> to vector<1x128xf32>
    %c1 = arith.constant 1 : index
    %c0_7 = arith.constant 0 : index
    %13 = vector.load %arg4[%c1, %c0_7] : memref<2x128xf32, #tpu.memory_space<vmem>>, vector<1x128xf32>
    %14 = vector.shape_cast %13 : vector<1x128xf32> to vector<128xf32>
    %15 = vector.shape_cast %14 : vector<128xf32> to vector<1x128xf32>
    %c1_i32_8 = arith.constant 1 : i32
    %16 = vector.broadcast %c1_i32_8 : i32 to vector<8x1xi32>
    %17 = arith.cmpi eq, %9, %16 : vector<8x1xi32>
    %18 = vector.shape_cast %17 : vector<8x1xi1> to vector<8x1xi1>
    %19 = vector.broadcast %18 : vector<8x1xi1> to vector<8x128xi1>
    %20 = vector.shape_cast %15 : vector<1x128xf32> to vector<1x128xf32>
    %21 = vector.broadcast %20 : vector<1x128xf32> to vector<8x128xf32>
    %22 = vector.shape_cast %12 : vector<1x128xf32> to vector<1x128xf32>
    %23 = vector.broadcast %22 : vector<1x128xf32> to vector<8x128xf32>
    %24 = arith.select %19, %21, %23 : vector<8x128xi1>, vector<8x128xf32>
    %c0_9 = arith.constant 0 : index
    %c0_10 = arith.constant 0 : index
    %25 = vector.load %arg5[%c0_9, %c0_10] : memref<8x128xf32, #tpu.memory_space<vmem>>, vector<8x128xf32>
    %26 = arith.addf %24, %25 : vector<8x128xf32>
    %c0_i32_11 = arith.constant 0 : i32
    %c0_i32_12 = arith.constant 0 : i32
    %27 = tpu.memref_slice %arg6[%c0_i32_11, %c0_i32_12] : memref<32x128xf32, #tpu.memory_space<any>> -> memref<8x128xf32, #tpu.memory_space<any>>
    %c0_i32_13 = arith.constant 0 : i32
    %c0_i32_14 = arith.constant 0 : i32
    %28 = tpu.memref_slice %arg8[%0, %c0_i32_13, %c0_i32_14] : memref<2x8x128xf32, #tpu.memory_space<vmem>> -> memref<1x8x128xf32, #tpu.memory_space<vmem>>
    %29 = tpu.memref_squeeze %28 : memref<1x8x128xf32, #tpu.memory_space<vmem>> -> memref<8x128xf32, #tpu.memory_space<vmem>>
    %30 = tpu.memref_slice %arg9[%0] : memref<2x!tpu.dma_semaphore, #tpu.memory_space<semaphore_mem>> -> memref<1x!tpu.dma_semaphore, #tpu.memory_space<semaphore_mem>>
    %31 = tpu.memref_squeeze %30 : memref<1x!tpu.dma_semaphore, #tpu.memory_space<semaphore_mem>> -> memref<!tpu.dma_semaphore, #tpu.memory_space<semaphore_mem>>
    tpu.wait_dma2 semaphore(%31 : memref<!tpu.dma_semaphore, #tpu.memory_space<semaphore_mem>>) src(%27 : memref<8x128xf32, #tpu.memory_space<any>>) dst(%29 : memref<8x128xf32, #tpu.memory_space<vmem>>)
    %32 = arith.index_cast %0 : i32 to index
    %c0_15 = arith.constant 0 : index
    %c0_16 = arith.constant 0 : index
    %33 = vector.load %arg8[%32, %c0_15, %c0_16] : memref<2x8x128xf32, #tpu.memory_space<vmem>>, vector<1x8x128xf32>
    %34 = vector.shape_cast %33 : vector<1x8x128xf32> to vector<8x128xf32>
    %35 = arith.addf %34, %26 : vector<8x128xf32>
    %c0_17 = arith.constant 0 : index
    %c0_18 = arith.constant 0 : index
    %c0_19 = arith.constant 0 : index
    %36 = vector.load %arg7[%c0_17, %c0_18, %c0_19] : memref<1x8x128xf32, #tpu.memory_space<vmem>>, vector<1x8x128xf32>
    %37 = vector.shape_cast %36 : vector<1x8x128xf32> to vector<8x128xf32>
    %38 = vector.shape_cast %35 : vector<8x128xf32> to vector<1x8x128xf32>
    tpu.vector_store %arg7[%c0_17, %c0_18, %c0_19], %38 {strides = array<i32>} : memref<1x8x128xf32, #tpu.memory_space<vmem>>, vector<1x8x128xf32>,
    return
  }
  func.func @transform_0(%arg0: i32, %arg1: i32, %arg2: memref<16xi32, #tpu.memory_space<smem>>) -> (i32, i32, i32) {
    %c0_i32 = arith.constant 0 : i32
    %c0_i32_0 = arith.constant 0 : i32
    return %arg1, %arg0, %c0_i32 : i32, i32, i32
  }
  func.func @transform_1(%arg0: i32, %arg1: i32, %arg2: memref<16xi32, #tpu.memory_space<smem>>) -> (i32, i32) {
    %c0_i32 = arith.constant 0 : i32
    %c0_i32_0 = arith.constant 0 : i32
    %c0_i32_1 = arith.constant 0 : i32
    return %c0_i32, %c0_i32_0 : i32, i32
  }
  func.func @transform_2(%arg0: i32, %arg1: i32, %arg2: memref<16xi32, #tpu.memory_space<smem>>) -> (i32, i32) {
    %c0_i32 = arith.constant 0 : i32
    %c0_i32_0 = arith.constant 0 : i32
    return %arg0, %c0_i32 : i32, i32
  }
  func.func @transform_4(%arg0: i32, %arg1: i32, %arg2: memref<16xi32, #tpu.memory_space<smem>>) -> (i32, i32, i32) {
    %c0_i32 = arith.constant 0 : i32
    %c0_i32_0 = arith.constant 0 : i32
    return %arg1, %arg0, %c0_i32 : i32, i32, i32
  }
}

</mosaic_0001>

<bundles_post_ra>
// kernel: tpu_custom_call.1
= control target key start
LH: loop header
LB: loop body
LE: loop exit
PB: predicated region body
PF: predicated region fallthrough
CT: control target
= control target key end

     0   :  { %s1382_s21 = smov [#allocation5]   ;;  %s1932_s0 = inlined_call_operand.vmem [shape: s32[16], index: 0, kind: input, shape index: {}]   ;;  %s1933_s1 = inlined_call_operand.vmem [shape: s32[2,8,1], index: 1, kind: input, shape index: {}]   ;;  %s1934_s2 = inlined_call_operand.vmem [shape: f32[2,128], index: 2, kind: input, shape index: {}]   ;;  %s1935_s3 = inlined_call_operand.vmem [shape: f32[8,128], index: 3, kind: input, shape index: {}]   ;;  %s1936_s4 = inlined_call_operand.hbm [shape: f32[32,128], index: 4, kind: input, shape index: {}]   ;;  %s1937_s5 = inlined_call_operand.hbm [shape: f32[2,8,128], index: 5, kind: output, shape index: {}]  }
   0x1   :  { %1957 = sst [smem:[#allocation60_spill]] %s1933_s1  ;;  %s11_s20 = sshll.u32 %s1932_s0, 4  ;;  %s12_s20 = int_to_ptr.vmem [resolvable:$true] %s11_s20 }
   0x2   :  { %14 = dma.vmem_to_smem %s12_s20, 16, %s1382_s21, [#allocation4] }
   0x3   :  { %1350 = dma.done.wait [#allocation4], 16 }
   0x4   :  { %1351 = vsyncadd [#allocation4], 4294967280 }
   0x5   :  { %17 = sfence }
   0x6   :  { %18 = vsyncpa [#allocation7], 0 }
   0x7   :  { %20 = vsyncpa [#allocation7 + $0x1], 0  ;;  %s1425_s22 = smov 0   ;;  %s1427_s23 = smov 0  }
   0x8   :  { %s1429_s24 = smov 0   ;;  %s1431_s25 = smov 0  }
   0x9   :  { %s1433_s26 = smov 0   ;;  %s1435_s27 = smov 0  }
   0xa LB: > { %1958 = sst [smem:[#allocation53_spill]] %s1368_s24  ;;  %s698_s0 = sadd.s32 4294967295, %s1380_s27   ;;  %s1380_s27 = sphi %s1435_s27, %s26_s27   ;;  %s1376_s26 = sphi %s1433_s26, %s2001_s26   ;;  %s1372_s25 = sphi %s1431_s25, %s2000_s25   ;;  %s1368_s24 = sphi %s1429_s24, %s1999_s24   ;;  %s1364_s23 = sphi %s1427_s23, %s2003_s23   ;;  %s1360_s22 = sphi %s1425_s22, %s2002_s22  }
   0xb   : > { %1959 = sst [smem:[#allocation54_spill]] %s1376_s26  ;;  %s699_s28 = sadd.s32 4294967294, %s1380_s27  }
   0xc   : > { %s35_s29 = sadd.s32 1, %s1376_s26  ;;  %s122_s30 = sadd.s32 1, %s1368_s24 }
   0xd   : > { %p36_p0 = scmp.ge.s32.totalorder %s35_s29, 2  ;;  %p132_p1 = scmp.ne.s32.totalorder %s1368_s24, %s1364_s23 }
   0xe   : > { %p133_p2 = scmp.eq.s32.totalorder %s698_s0, 1  ;;  %p138_p3 = scmp.ne.s32.totalorder %s1364_s23, %s1360_s22 }
   0xf   : > { %s2005_s29 = smov (%p36_p0, %s35_s29), 0  ;;  %p139_p5 = scmp.eq.s32.totalorder %s699_s28, 1 }
  0x10   : > { %1960 = sst [smem:[#allocation55_spill]] %s2005_s29  ;;  %p1465_p4 = por %p133_p2, %p132_p1 }
  0x11   : > { %s117_s7 = ssub.s32 %s1376_s26, %s2005_s29  ;;  %p703_p6 = scmp.ge.s32.totalorder %s1380_s27, 1 }
  0x12   : > { %p120_p7 = scmp.eq.s32.totalorder %s117_s7, 0  ;;  %p1472_p8 = por %p139_p5, %p138_p3 }
  0x13   : > { %p177_p9 = scmp.lt.s32.totalorder %s1380_s27, 3 }
  0x14   : > { %s1962_s8 = scalar_select %p1472_p8, 1, 0 }
  0x15   : > { %s1478_s9 = scalar_select %p120_p7, %s1368_s24, %s122_s30  }
  0x16   : > { %1963 = sst [smem:[#allocation56_spill]] %s1962_s8  ;;  %p178_p10 = pnand %p703_p6, %p177_p9 }
  0x17   : > { %1964 = sst [smem:[#allocation57_spill]] %s1478_s9 }
  0x18   : > { %181 = sbr.rel (%p178_p10) target bundleno = 436 (0x1b4), region = 32 }
  0x1d   : > { %p207_p11 = scmp.lt.s32.totalorder %s1372_s25, 1  ;;  %s1938_s10 = sand.u32 1, %s1364_s23   ;;  %v1383_v0 = vmov 0  }
  0x1e   : > { %835 = vset.pattern.permute.xlu0 %v1383_v0  ;;  %s1484_s11 = sshll.u32 %s1938_s10, 3  ;;  %p774_p12 = scmp.eq.s32.totalorder %s1372_s25, 0 }
  0x1f   : > { %s208_s12 = scalar_select %p207_p11, %s1372_s25, 1 }
  0x20   : > { %s229_s14 = sld [smem:[#allocation5]]  ;;  %s1939_s18 = smov [#allocation2]  }
  0x21   : > { %s705_s13 = sshll.u32 %s208_s12, 3  ;;  %s1965_s1 = sld [smem:[#allocation60_spill]] }
  0x22   : > { %s1492_s19 = sshll.u32 %s1939_s18, 4  ;;  %s1494_s20 = sld [smem:[#allocation5 + $0x1]]  ;;  %s241_s19 = int_to_ptr.vmem [resolvable:$true] %s1492_s19 }
  0x23   : > { %s1385_s21 = smov [#allocation2 + $0x1]   ;;  %s709_s28 = sld [smem:[#allocation5 + $0x2]] }
  0x24   : > { %s1497_s0 = sshll.u32 %s1385_s21, 4  ;;  %s1515_s7 = scalar_lea.hbm %s1936_s4, 32  ;;  %s258_s0 = int_to_ptr.vmem [resolvable:$true] %s1497_s0 }
  0x26   : > { %s230_s12 = scalar_lea.hbm %s1936_s4, %s229_s14 }
  0x27   : > { %s213_s17 = scalar_lea.vmem %s1965_s1, %s705_s13  ;;  %s1386_s13 = smov [#allocation2 + $0x2]  }
  0x28   : > { %v516_v1 = vld [vmem:[%s213_s17] sm:$0xff]  ;;  %s1503_s15 = sshll.u32 %s1386_s13, 4  ;;  %s238_s16 = sshll.u32 %s230_s12, 4  ;;  %s239_s16 = int_to_ptr.hbm [resolvable:$true] %s238_s16 }
  0x29   : > { %vm519_vm0 = vcmp.eq.s32.totalorder %v516_v1, 1  ;;  %1966 = sst [smem:[#allocation58_spill]] %s1503_s15  ;;  %s246_s21 = scalar_lea.hbm %s1936_s4, %s1494_s20 }
  0x2a   : > { %v520_v2 = vsel %vm519_vm0, 1, %v1383_v0  ;;  %s850_s18 = sshra.s32 %s239_s16, 4  ;;  %s851_s18 = int_to_ptr.hbm [resolvable:$true] %s850_s18 }
  0x2b   : > { %522 = vperm.xlu0 %835, %v520_v2   ;;  %s852_s1 = scalar_lea.hbm %s851_s18, 1  ;;  %p857_p2 = scmp.lt.s32.totalorder %s851_s18, %s1936_s4 }
  0x2c   : > { %p853_p13 = scmp.ne.s32.totalorder %s851_s18, %s852_s1  ;;  %p858_p3 = scmp.lt.s32.totalorder %s1515_s7, %s852_s1 }
  0x2e   : > { %p854_p0 = pnand %p853_p13, %p774_p12  ;;  %p859_p5 = por %p858_p3, %p857_p2 }
  0x30   : > { %p855_p1 = pneg %p854_p0 }
  0x32   : > { %p860_p6 = pnand %p859_p5, %p855_p1 }
  0x34   : > { %863 = shalt.err (!%p860_p6)  }
  0x35   : > { %735 = dma.hbm_to_vmem [thread:$0]  (%p774_p12), %s239_s16, 16, %s241_s19, [#allocation3] }
  0x36   : > { %s255_s10 = sshll.u32 %s246_s21, 4  ;;  %s263_s30 = scalar_lea.hbm %s1936_s4, %s709_s28  ;;  %s256_s10 = int_to_ptr.hbm [resolvable:$true] %s255_s10 }
  0x37   : > { %s272_s14 = sshll.u32 %s263_s30, 4  ;;  %s878_s15 = sshra.s32 %s256_s10, 4  ;;  %s879_s15 = int_to_ptr.hbm [resolvable:$true] %s878_s15  ;;  %s273_s14 = int_to_ptr.hbm [resolvable:$true] %s272_s14 }
  0x38   : > { %s880_s13 = scalar_lea.hbm %s879_s15, 1  ;;  %p885_p11 = scmp.lt.s32.totalorder %s879_s15, %s1936_s4 }
  0x39   : > { %p881_p7 = scmp.ne.s32.totalorder %s879_s15, %s880_s13  ;;  %p886_p13 = scmp.lt.s32.totalorder %s1515_s7, %s880_s13 }
  0x3b   : > { %p882_p9 = pnand %p881_p7, %p774_p12  ;;  %p887_p0 = por %p886_p13, %p885_p11 }
  0x3d   : > { %p883_p10 = pneg %p882_p9 }
  0x3f   : > { %p888_p1 = pnand %p887_p0, %p883_p10 }
  0x41   : > { %891 = shalt.err (!%p888_p1)  }
  0x42   : > { %736 = dma.hbm_to_vmem [thread:$0]  (%p774_p12), %s256_s10, 16, %s258_s0, [#allocation3] }
  0x43   : > { %s710_s19 = sld [smem:[#allocation5 + $0x3]]  ;;  %s906_s28 = sshra.s32 %s273_s14, 4  ;;  %s907_s28 = int_to_ptr.hbm [resolvable:$true] %s906_s28 }
  0x44   : > { %s908_s16 = scalar_lea.hbm %s907_s28, 1  ;;  %p913_p6 = scmp.lt.s32.totalorder %s907_s28, %s1936_s4 }
  0x45   : > { %p909_p2 = scmp.ne.s32.totalorder %s907_s28, %s908_s16  ;;  %p914_p7 = scmp.lt.s32.totalorder %s1515_s7, %s908_s16 }
  0x47   : > { %p910_p3 = pnand %p909_p2, %p774_p12  ;;  %p915_p9 = por %p914_p7, %p913_p6 }
  0x49   : > { %p911_p5 = pneg %p910_p3 }
  0x4b   : > { %p916_p10 = pnand %p915_p9, %p911_p5 }
  0x4d   : > { %919 = shalt.err (!%p916_p10)  }
  0x4e   : > { %s1967_s0 = sld [smem:[#allocation58_spill]]  ;;  %s1387_s20 = smov [#allocation2 + $0x3]  }
  0x4f   : > { %s711_s10 = sld [smem:[#allocation5 + $0x4]]  ;;  %s291_s17 = sshll.u32 %s1387_s20, 4  ;;  %s292_s17 = int_to_ptr.vmem [resolvable:$true] %s291_s17 }
  0x50   : > { %s1388_s30 = smov [#allocation2 + $0x4]   ;;  %s1549_s1 = sld [smem:[#allocation5 + $0x5]] }
  0x51   : > { %s1546_s13 = sshll.u32 %s1388_s30, 4  ;;  %s280_s16 = scalar_lea.hbm %s1936_s4, %s710_s19 }
  0x52   : > { %1969 = sst [smem:[#allocation58_spill]] %s1546_s13  ;;  %s289_s15 = sshll.u32 %s280_s16, 4  ;;  %s290_s15 = int_to_ptr.hbm [resolvable:$true] %s289_s15 }
  0x53   : > { %s1389_s21 = smov [#allocation2 + $0x5]   ;;  %s934_s30 = sshra.s32 %s290_s15, 4  ;;  %s935_s30 = int_to_ptr.hbm [resolvable:$true] %s934_s30 }
  0x54   : > { %s1968_s12 = int_to_ptr.vmem [resolvable:$true] %s1967_s0  ;;  %s936_s29 = scalar_lea.hbm %s935_s30, 1 }
  0x55   : > { %737 = dma.hbm_to_vmem [thread:$0]  (%p774_p12), %s273_s14, 16, %s1968_s12, [#allocation3] }
  0x56   : > { %s1554_s14 = sshll.u32 %s1389_s21, 4  ;;  %s297_s20 = scalar_lea.hbm %s1936_s4, %s711_s10  ;;  %s326_s14 = int_to_ptr.vmem [resolvable:$true] %s1554_s14 }
  0x57   : > { %p937_p11 = scmp.ne.s32.totalorder %s935_s30, %s936_s29  ;;  %p941_p1 = scmp.lt.s32.totalorder %s935_s30, %s1936_s4 }
  0x58   : > { %p942_p2 = scmp.lt.s32.totalorder %s1515_s7, %s936_s29 }
  0x59   : > { %p938_p13 = pnand %p937_p11, %p774_p12 }
  0x5a   : > { %p943_p3 = por %p942_p2, %p941_p1 }
  0x5b   : > { %p939_p0 = pneg %p938_p13 }
  0x5d   : > { %p944_p5 = pnand %p943_p3, %p939_p0 }
  0x5f   : > { %947 = shalt.err (!%p944_p5)  }
  0x60   : > { %738 = dma.hbm_to_vmem [thread:$0]  (%p774_p12), %s290_s15, 16, %s292_s17, [#allocation3] }
  0x61   : > { %s306_s19 = sshll.u32 %s297_s20, 4  ;;  %s314_s28 = scalar_lea.hbm %s1936_s4, %s1549_s1  ;;  %s307_s19 = int_to_ptr.hbm [resolvable:$true] %s306_s19 }
  0x62   : > { %s962_s26 = sshra.s32 %s307_s19, 4  ;;  %s963_s26 = int_to_ptr.hbm [resolvable:$true] %s962_s26 }
  0x63   : > { %s964_s29 = scalar_lea.hbm %s963_s26, 1  ;;  %p969_p10 = scmp.lt.s32.totalorder %s963_s26, %s1936_s4 }
  0x64   : > { %p965_p6 = scmp.ne.s32.totalorder %s963_s26, %s964_s29  ;;  %p970_p11 = scmp.lt.s32.totalorder %s1515_s7, %s964_s29 }
  0x66   : > { %p966_p7 = pnand %p965_p6, %p774_p12  ;;  %p971_p13 = por %p970_p11, %p969_p10 }
  0x68   : > { %p967_p9 = pneg %p966_p7 }
  0x6a   : > { %p972_p0 = pnand %p971_p13, %p967_p9 }
  0x6c   : > { %975 = shalt.err (!%p972_p0)  }
  0x6d   : > { %s1970_s17 = sld [smem:[#allocation58_spill]]  ;;  %s323_s1 = sshll.u32 %s314_s28, 4  ;;  %s324_s1 = int_to_ptr.hbm [resolvable:$true] %s323_s1 }
  0x6e   : > { %s713_s21 = sld [smem:[#allocation5 + $0x6]]  ;;  %s990_s0 = sshra.s32 %s324_s1, 4  ;;  %s991_s0 = int_to_ptr.hbm [resolvable:$true] %s990_s0 }
  0x6f   : > { %s992_s12 = scalar_lea.hbm %s991_s0, 1  ;;  %p997_p5 = scmp.lt.s32.totalorder %s991_s0, %s1936_s4 }
  0x70   : > { %p993_p1 = scmp.ne.s32.totalorder %s991_s0, %s992_s12  ;;  %p998_p6 = scmp.lt.s32.totalorder %s1515_s7, %s992_s12 }
  0x72   : > { %p994_p2 = pnand %p993_p1, %p774_p12  ;;  %p999_p7 = por %p998_p6, %p997_p5 }
  0x73   : > { %s1971_s15 = int_to_ptr.vmem [resolvable:$true] %s1970_s17 }
  0x74   : > { %739 = dma.hbm_to_vmem [thread:$0]  (%p774_p12), %s307_s19, 16, %s1971_s15, [#allocation3] }
  0x75   : > { %p995_p3 = pneg %p994_p2 }
  0x77   : > { %p1000_p9 = pnand %p999_p7, %p995_p3 }
  0x79   : > { %1003 = shalt.err (!%p1000_p9)  }
  0x7a   : > { %740 = dma.hbm_to_vmem [thread:$0]  (%p774_p12), %s324_s1, 16, %s326_s14, [#allocation3] }
  0x7b   : > { %s1390_s19 = smov [#allocation2 + $0x6]   ;;  %s714_s18 = sld [smem:[#allocation5 + $0x7]] }
  0x7c   : > { %s342_s10 = sshll.u32 %s1390_s19, 4  ;;  %s1391_s28 = smov [#allocation2 + $0x7]   ;;  %s343_s10 = int_to_ptr.vmem [resolvable:$true] %s342_s10 }
  0x7d   : > { %s1592_s26 = sshll.u32 %s1391_s28, 4  ;;  %p218_p10 = scmp.lt.s32.totalorder %s1372_s25, 0  ;;  %s360_s26 = int_to_ptr.vmem [resolvable:$true] %s1592_s26 }
  0x7e   : > { %s331_s16 = scalar_lea.hbm %s1936_s4, %s713_s21  ;;  %s219_s15 = ssub.s32 0, %s1372_s25 }
  0x7f   : > { %s340_s17 = sshll.u32 %s331_s16, 4  ;;  %s1601_s14 = smin.u32 %s1372_s25, %s219_s15  ;;  %s341_s17 = int_to_ptr.hbm [resolvable:$true] %s340_s17 }
  0x80   : > { %s1018_s1 = sshra.s32 %s341_s17, 4  ;;  %s1019_s1 = int_to_ptr.hbm [resolvable:$true] %s1018_s1 }
  0x81   : > { %s1020_s0 = scalar_lea.hbm %s1019_s1, 1  ;;  %p1025_p1 = scmp.lt.s32.totalorder %s1019_s1, %s1936_s4 }
  0x82   : > { %p1021_p11 = scmp.ne.s32.totalorder %s1019_s1, %s1020_s0  ;;  %p1026_p2 = scmp.lt.s32.totalorder %s1515_s7, %s1020_s0 }
  0x84   : > { %p1022_p13 = pnand %p1021_p11, %p774_p12  ;;  %p1027_p3 = por %p1026_p2, %p1025_p1 }
  0x86   : > { %p1023_p0 = pneg %p1022_p13 }
  0x88   : > { %p1028_p5 = pnand %p1027_p3, %p1023_p0 }
  0x8a   : > { %1031 = shalt.err (!%p1028_p5)  }
  0x8b   : > { %741 = dma.hbm_to_vmem [thread:$0]  (%p774_p12), %s341_s17, 16, %s343_s10, [#allocation3] }
  0x8c   : > { %s348_s19 = scalar_lea.hbm %s1936_s4, %s714_s18  ;;  %s221_s28 = sand.u32 1, %s1601_s14  }
  0x8d   : > { %s357_s29 = sshll.u32 %s348_s19, 4  ;;  %s222_s13 = ssub.s32 0, %s221_s28  ;;  %s358_s29 = int_to_ptr.hbm [resolvable:$true] %s357_s29 }
  0x8e   : > { %s363_s16 = sadd.s32 1, %s1372_s25  ;;  %s1046_s15 = sshra.s32 %s358_s29, 4  ;;  %s1047_s15 = int_to_ptr.hbm [resolvable:$true] %s1046_s15 }
  0x8f   : > { %s1048_s1 = scalar_lea.hbm %s1047_s15, 1  ;;  %p1053_p11 = scmp.lt.s32.totalorder %s1047_s15, %s1936_s4 }
  0x90   : > { %p1049_p6 = scmp.ne.s32.totalorder %s1047_s15, %s1048_s1  ;;  %p1054_p13 = scmp.lt.s32.totalorder %s1515_s7, %s1048_s1 }
  0x92   : > { %p1050_p7 = pnand %p1049_p6, %p774_p12  ;;  %p1055_p0 = por %p1054_p13, %p1053_p11 }
  0x94   : > { %p1051_p9 = pneg %p1050_p7 }
  0x96   : > { %p1056_p1 = pnand %p1055_p0, %p1051_p9 }
  0x98   : > { %1059 = shalt.err (!%p1056_p1)  }
  0x99   : > { %742 = dma.hbm_to_vmem [thread:$0]  (%p774_p12), %s358_s29, 16, %s360_s26, [#allocation3] }
  0x9a   : > { %s2007_s13 = smov (!%p218_p10, %s222_s13), %s221_s28  ;;  %p1630_p2 = scmp.lt.s32.totalorder %s363_s16, 2 }
  0x9b   : > { %s368_s18 = ssub.s32 1, %s2007_s13  ;;  %s1944_s17 = sshll.u32 %s1372_s25, 3 }
  0x9c   : > { %s1638_s14 = sadd.s32 8, %s1944_s17  ;;  %s717_s26 = sshll.u32 %s368_s18, 3 }
  0x9d   : > { %s744_s20 = scalar_select %p1630_p2, [#allocation5], [#allocation42] }
  0x9e   : > { %s745_s21 = scalar_select %p1630_p2, %s1638_s14, 0 }
  0x9f   : > { %s1645_s19 = scalar_lea.vmem [#allocation2], %s717_s26  ;;  %s390_s16 = sadd.s32 1, %s1638_s14 }
  0xa0   : > { %s372_s30 = sld [smem:[%s744_s20 + %s745_s21]]  ;;  %s386_s28 = sshll.u32 %s1645_s19, 4  ;;  %s1648_s28 = int_to_ptr.vmem [resolvable:$true] %s386_s28 }
  0xa1   : > { %s623_s15 = scalar_lea.vmem %s1645_s19, 1 [#allocation2]  ;;  %s2009_s16 = smov (!%p1630_p2, %s390_s16), 0 }
  0xa2   : > { %s747_s1 = scalar_select %p1630_p2, [#allocation5], [#allocation43] }
  0xa3   : > { %s1660_s26 = sshll.u32 %s623_s15, 4  ;;  %s1665_s29 = scalar_lea.sflag [#allocation3], %s368_s18 }
  0xa4   : > { %1973 = sst [smem:[#allocation58_spill]] %s1660_s26 }
  0xa5   : > { %s1662_s17 = sld [smem:[%s747_s1 + %s2009_s16]] }
  0xa6   : > { %s373_s20 = scalar_lea.hbm %s1936_s4, %s372_s30 }
  0xa7   : > { %s384_s21 = sshll.u32 %s373_s20, 4  ;;  %s385_s21 = int_to_ptr.hbm [resolvable:$true] %s384_s21 }
  0xa8   : > { %s1074_s9 = sshra.s32 %s385_s21, 4  ;;  %s1075_s9 = int_to_ptr.hbm [resolvable:$true] %s1074_s9 }
  0xa9   : > { %s1076_s24 = scalar_lea.hbm %s1075_s9, 1  ;;  %p1081_p5 = scmp.lt.s32.totalorder %s1075_s9, %s1936_s4 }
  0xaa   : > { %p1077_p12 = scmp.ne.s32.totalorder %s1075_s9, %s1076_s24  ;;  %p1082_p6 = scmp.lt.s32.totalorder %s1515_s7, %s1076_s24 }
  0xac   : > { %p1078_p10 = pnand %p1077_p12, %p1630_p2  ;;  %p1083_p7 = por %p1082_p6, %p1081_p5 }
  0xae   : > { %p1079_p3 = pneg %p1078_p10 }
  0xb0   : > { %p1084_p9 = pnand %p1083_p7, %p1079_p3 }
  0xb2   : > { %1087 = shalt.err (!%p1084_p9)  }
  0xb3   : > { %s1088_s30 = sshra.s32 %s1648_s28, 4  ;;  %s1974_s16 = smov [#allocation2]   ;;  %s1089_s30 = int_to_ptr.vmem [resolvable:$true] %s1088_s30 }
  0xb4   : > { %s1090_s18 = scalar_lea.vmem %s1089_s30, 1  ;;  %s1677_s15 = scalar_lea.vmem %s1974_s16, 16 }
  0xb5   : > { %p1091_p11 = scmp.ne.s32.totalorder %s1089_s30, %s1090_s18  ;;  %p1096_p1 = scmp.lt.s32.totalorder %s1677_s15, %s1090_s18 }
  0xb7   : > { %p1092_p13 = pnand %p1091_p11, %p1630_p2 }
  0xb9   : > { %p1093_p0 = pneg %p1092_p13 }
  0xbb   : > { %p1098_p12 = pnand %p1096_p1, %p1093_p0 }
  0xbd   : > { %1101 = shalt.err (!%p1098_p12)  }
  0xbe   : > { %746 = dma.hbm_to_vmem [thread:$0]  (%p1630_p2), %s385_s21, 16, %s1648_s28, %s1665_s29 }
  0xbf   : > { %s408_s24 = sadd.s32 2, %s1638_s14  ;;  %s627_s8 = scalar_lea.vmem %s1645_s19, 2 [#allocation2] }
  0xc0   : > { %s750_s9 = scalar_select %p1630_p2, [#allocation5], [#allocation44] }
  0xc1   : > { %s2011_s24 = smov (!%p1630_p2, %s408_s24), 0  ;;  %s392_s20 = scalar_lea.hbm %s1936_s4, %s1662_s17 }
  0xc2   : > { %s1694_s0 = sshll.u32 %s627_s8, 4  ;;  %s402_s30 = sshll.u32 %s392_s20, 4  ;;  %s403_s30 = int_to_ptr.hbm [resolvable:$true] %s402_s30 }
  0xc3   : > { %1975 = sst [smem:[#allocation59_spill]] %s1694_s0  ;;  %s1102_s28 = sshra.s32 %s403_s30, 4  ;;  %s1103_s28 = int_to_ptr.hbm [resolvable:$true] %s1102_s28 }
  0xc4   : > { %s1696_s18 = sld [smem:[%s750_s9 + %s2011_s24]]  ;;  %s1104_s21 = scalar_lea.hbm %s1103_s28, 1 }
  0xc5   : > { %p1105_p10 = scmp.ne.s32.totalorder %s1103_s28, %s1104_s21  ;;  %p1109_p6 = scmp.lt.s32.totalorder %s1103_s28, %s1936_s4 }
  0xc6   : > { %p1110_p7 = scmp.lt.s32.totalorder %s1515_s7, %s1104_s21 }
  0xc7   : > { %p1106_p3 = pnand %p1105_p10, %p1630_p2 }
  0xc8   : > { %p1111_p9 = por %p1110_p7, %p1109_p6 }
  0xc9   : > { %p1107_p5 = pneg %p1106_p3 }
  0xcb   : > { %p1112_p11 = pnand %p1111_p9, %p1107_p5 }
  0xcd   : > { %1115 = shalt.err (!%p1112_p11)  }
  0xce   : > { %s1976_s17 = sld [smem:[#allocation58_spill]] }
  0xd4   : > { %s1977_s24 = int_to_ptr.vmem [resolvable:$true] %s1976_s17 }
  0xd5   : > { %s1116_s8 = sshra.s32 %s1977_s24, 4  ;;  %s1117_s8 = int_to_ptr.vmem [resolvable:$true] %s1116_s8 }
  0xd6   : > { %s1118_s9 = scalar_lea.vmem %s1117_s8, 1 }
  0xd7   : > { %p1119_p13 = scmp.ne.s32.totalorder %s1117_s8, %s1118_s9  ;;  %p1124_p12 = scmp.lt.s32.totalorder %s1677_s15, %s1118_s9 }
  0xd9   : > { %p1120_p0 = pnand %p1119_p13, %p1630_p2 }
  0xdb   : > { %p1121_p1 = pneg %p1120_p0 }
  0xdd   : > { %p1126_p10 = pnand %p1124_p12, %p1121_p1 }
  0xdf   : > { %1129 = shalt.err (!%p1126_p10)  }
  0xe0   : > { %s1978_s26 = smov %s1977_s24  ;;  %s426_s1 = sadd.s32 3, %s1638_s14 }
  0xe1   : > { %749 = dma.hbm_to_vmem [thread:$0]  (%p1630_p2), %s403_s30, 16, %s1978_s26, %s1665_s29 }
  0xe2   : > { %s631_s12 = scalar_lea.vmem %s1645_s19, 3 [#allocation2]  ;;  %s2013_s1 = smov (!%p1630_p2, %s426_s1), 0 }
  0xe3   : > { %s753_s20 = scalar_select %p1630_p2, [#allocation5], [#allocation45] }
  0xe4   : > { %s410_s16 = scalar_lea.hbm %s1936_s4, %s1696_s18  ;;  %s1725_s24 = sshll.u32 %s631_s12, 4 }
  0xe5   : > { %1979 = sst [smem:[#allocation58_spill]] %s1725_s24  ;;  %s420_s17 = sshll.u32 %s410_s16, 4  ;;  %s421_s17 = int_to_ptr.hbm [resolvable:$true] %s420_s17 }
  0xe6   : > { %s1727_s8 = sld [smem:[%s753_s20 + %s2013_s1]]  ;;  %s1130_s30 = sshra.s32 %s421_s17, 4  ;;  %s1131_s30 = int_to_ptr.hbm [resolvable:$true] %s1130_s30 }
  0xe7   : > { %s1132_s9 = scalar_lea.hbm %s1131_s30, 1  ;;  %p1137_p7 = scmp.lt.s32.totalorder %s1131_s30, %s1936_s4 }
  0xe8   : > { %p1133_p3 = scmp.ne.s32.totalorder %s1131_s30, %s1132_s9  ;;  %p1138_p9 = scmp.lt.s32.totalorder %s1515_s7, %s1132_s9 }
  0xea   : > { %p1134_p5 = pnand %p1133_p3, %p1630_p2  ;;  %p1139_p11 = por %p1138_p9, %p1137_p7 }
  0xec   : > { %p1135_p6 = pneg %p1134_p5 }
  0xee   : > { %p1140_p13 = pnand %p1139_p11, %p1135_p6 }
  0xf0   : > { %1143 = shalt.err (!%p1140_p13)  }
  0xf1   : > { %s1980_s18 = sld [smem:[#allocation59_spill]] }
  0xf7   : > { %s1981_s1 = int_to_ptr.vmem [resolvable:$true] %s1980_s18 }
  0xf8   : > { %s1144_s12 = sshra.s32 %s1981_s1, 4  ;;  %s1145_s12 = int_to_ptr.vmem [resolvable:$true] %s1144_s12 }
  0xf9   : > { %s1146_s20 = scalar_lea.vmem %s1145_s12, 1 }
  0xfa   : > { %p1147_p0 = scmp.ne.s32.totalorder %s1145_s12, %s1146_s20  ;;  %p1152_p10 = scmp.lt.s32.totalorder %s1677_s15, %s1146_s20 }
  0xfc   : > { %p1148_p1 = pnand %p1147_p0, %p1630_p2 }
  0xfe   : > { %p1149_p12 = pneg %p1148_p1 }
 0x100   : > { %p1154_p3 = pnand %p1152_p10, %p1149_p12 }
 0x102   : > { %1157 = shalt.err (!%p1154_p3)  }
 0x103   : > { %s1982_s0 = smov %s1981_s1  ;;  %s444_s28 = sadd.s32 4, %s1638_s14 }
 0x104   : > { %752 = dma.hbm_to_vmem [thread:$0]  (%p1630_p2), %s421_s17, 16, %s1982_s0, %s1665_s29 }
 0x105   : > { %s635_s21 = scalar_lea.vmem %s1645_s19, 4 [#allocation2]  ;;  %s2015_s28 = smov (!%p1630_p2, %s444_s28), 0 }
 0x106   : > { %s756_s16 = scalar_select %p1630_p2, [#allocation5], [#allocation46] }
 0x107   : > { %s428_s26 = scalar_lea.hbm %s1936_s4, %s1727_s8  ;;  %s1756_s1 = sshll.u32 %s635_s21, 4 }
 0x108   : > { %1983 = sst [smem:[#allocation59_spill]] %s1756_s1  ;;  %s438_s18 = sshll.u32 %s428_s26, 4  ;;  %s439_s18 = int_to_ptr.hbm [resolvable:$true] %s438_s18 }
 0x109   : > { %s1758_s12 = sld [smem:[%s756_s16 + %s2015_s28]]  ;;  %s1158_s17 = sshra.s32 %s439_s18, 4  ;;  %s1159_s17 = int_to_ptr.hbm [resolvable:$true] %s1158_s17 }
 0x10a   : > { %s1160_s20 = scalar_lea.hbm %s1159_s17, 1  ;;  %p1165_p9 = scmp.lt.s32.totalorder %s1159_s17, %s1936_s4 }
 0x10b   : > { %p1161_p5 = scmp.ne.s32.totalorder %s1159_s17, %s1160_s20  ;;  %p1166_p11 = scmp.lt.s32.totalorder %s1515_s7, %s1160_s20 }
 0x10d   : > { %p1162_p6 = pnand %p1161_p5, %p1630_p2  ;;  %p1167_p13 = por %p1166_p11, %p1165_p9 }
 0x10f   : > { %p1163_p7 = pneg %p1162_p6 }
 0x111   : > { %p1168_p0 = pnand %p1167_p13, %p1163_p7 }
 0x113   : > { %1171 = shalt.err (!%p1168_p0)  }
 0x114   : > { %s1984_s8 = sld [smem:[#allocation58_spill]] }
 0x11a   : > { %s1985_s28 = int_to_ptr.vmem [resolvable:$true] %s1984_s8 }
 0x11b   : > { %s1172_s21 = sshra.s32 %s1985_s28, 4  ;;  %s1173_s21 = int_to_ptr.vmem [resolvable:$true] %s1172_s21 }
 0x11c   : > { %s1174_s16 = scalar_lea.vmem %s1173_s21, 1 }
 0x11d   : > { %p1175_p1 = scmp.ne.s32.totalorder %s1173_s21, %s1174_s16  ;;  %p1180_p3 = scmp.lt.s32.totalorder %s1677_s15, %s1174_s16 }
 0x11f   : > { %p1176_p12 = pnand %p1175_p1, %p1630_p2 }
 0x121   : > { %p1177_p10 = pneg %p1176_p12 }
 0x123   : > { %p1182_p5 = pnand %p1180_p3, %p1177_p10 }
 0x125   : > { %1185 = shalt.err (!%p1182_p5)  }
 0x126   : > { %s1986_s24 = smov %s1985_s28  ;;  %s462_s30 = sadd.s32 5, %s1638_s14 }
 0x127   : > { %755 = dma.hbm_to_vmem [thread:$0]  (%p1630_p2), %s439_s18, 16, %s1986_s24, %s1665_s29 }
 0x128   : > { %s639_s9 = scalar_lea.vmem %s1645_s19, 5 [#allocation2]  ;;  %s2017_s30 = smov (!%p1630_p2, %s462_s30), 0 }
 0x129   : > { %s759_s26 = scalar_select %p1630_p2, [#allocation5], [#allocation47] }
 0x12a   : > { %s446_s0 = scalar_lea.hbm %s1936_s4, %s1758_s12  ;;  %s1787_s28 = sshll.u32 %s639_s9, 4 }
 0x12b   : > { %1987 = sst [smem:[#allocation58_spill]] %s1787_s28  ;;  %s456_s8 = sshll.u32 %s446_s0, 4  ;;  %s457_s8 = int_to_ptr.hbm [resolvable:$true] %s456_s8 }
 0x12c   : > { %s1789_s21 = sld [smem:[%s759_s26 + %s2017_s30]]  ;;  %s1186_s18 = sshra.s32 %s457_s8, 4  ;;  %s1187_s18 = int_to_ptr.hbm [resolvable:$true] %s1186_s18 }
 0x12d   : > { %s1188_s16 = scalar_lea.hbm %s1187_s18, 1  ;;  %p1193_p11 = scmp.lt.s32.totalorder %s1187_s18, %s1936_s4 }
 0x12e   : > { %p1189_p6 = scmp.ne.s32.totalorder %s1187_s18, %s1188_s16  ;;  %p1194_p13 = scmp.lt.s32.totalorder %s1515_s7, %s1188_s16 }
 0x130   : > { %p1190_p7 = pnand %p1189_p6, %p1630_p2  ;;  %p1195_p0 = por %p1194_p13, %p1193_p11 }
 0x132   : > { %p1191_p9 = pneg %p1190_p7 }
 0x134   : > { %p1196_p1 = pnand %p1195_p0, %p1191_p9 }
 0x136   : > { %1199 = shalt.err (!%p1196_p1)  }
 0x137   : > { %s1988_s12 = sld [smem:[#allocation59_spill]] }
 0x13d   : > { %s1989_s30 = int_to_ptr.vmem [resolvable:$true] %s1988_s12 }
 0x13e   : > { %s1200_s9 = sshra.s32 %s1989_s30, 4  ;;  %s1201_s9 = int_to_ptr.vmem [resolvable:$true] %s1200_s9 }
 0x13f   : > { %s1202_s26 = scalar_lea.vmem %s1201_s9, 1 }
 0x140   : > { %p1203_p12 = scmp.ne.s32.totalorder %s1201_s9, %s1202_s26  ;;  %p1208_p5 = scmp.lt.s32.totalorder %s1677_s15, %s1202_s26 }
 0x142   : > { %p1204_p10 = pnand %p1203_p12, %p1630_p2 }
 0x144   : > { %p1205_p3 = pneg %p1204_p10 }
 0x146   : > { %p1210_p6 = pnand %p1208_p5, %p1205_p3 }
 0x148   : > { %1213 = shalt.err (!%p1210_p6)  }
 0x149   : > { %s1990_s1 = smov %s1989_s30  ;;  %s480_s17 = sadd.s32 6, %s1638_s14 }
 0x14a   : > { %758 = dma.hbm_to_vmem [thread:$0]  (%p1630_p2), %s457_s8, 16, %s1990_s1, %s1665_s29 }
 0x14b   : > { %s643_s20 = scalar_lea.vmem %s1645_s19, 6 [#allocation2]  ;;  %s2019_s17 = smov (!%p1630_p2, %s480_s17), 0 }
 0x14c   : > { %s762_s0 = scalar_select %p1630_p2, [#allocation5], [#allocation48] }
 0x14d   : > { %s464_s24 = scalar_lea.hbm %s1936_s4, %s1789_s21  ;;  %s1818_s30 = sshll.u32 %s643_s20, 4  ;;  %s495_s30 = int_to_ptr.vmem [resolvable:$true] %s1818_s30 }
 0x14e   : > { %s474_s12 = sshll.u32 %s464_s24, 4  ;;  %s1820_s9 = sld [smem:[%s762_s0 + %s2019_s17]]  ;;  %s475_s12 = int_to_ptr.hbm [resolvable:$true] %s474_s12 }
 0x14f   : > { %s1214_s26 = sshra.s32 %s475_s12, 4  ;;  %s1215_s26 = int_to_ptr.hbm [resolvable:$true] %s1214_s26 }
 0x150   : > { %s1216_s8 = scalar_lea.hbm %s1215_s26, 1  ;;  %p1221_p13 = scmp.lt.s32.totalorder %s1215_s26, %s1936_s4 }
 0x151   : > { %p1217_p7 = scmp.ne.s32.totalorder %s1215_s26, %s1216_s8  ;;  %p1222_p0 = scmp.lt.s32.totalorder %s1515_s7, %s1216_s8 }
 0x153   : > { %p1218_p9 = pnand %p1217_p7, %p1630_p2  ;;  %p1223_p1 = por %p1222_p0, %p1221_p13 }
 0x155   : > { %p1219_p11 = pneg %p1218_p9 }
 0x157   : > { %p1224_p12 = pnand %p1223_p1, %p1219_p11 }
 0x159   : > { %1227 = shalt.err (!%p1224_p12)  }
 0x15a   : > { %s1991_s21 = sld [smem:[#allocation58_spill]] }
 0x160   : > { %s1992_s20 = int_to_ptr.vmem [resolvable:$true] %s1991_s21 }
 0x161   : > { %s1228_s17 = sshra.s32 %s1992_s20, 4  ;;  %s1229_s17 = int_to_ptr.vmem [resolvable:$true] %s1228_s17 }
 0x162   : > { %s1230_s0 = scalar_lea.vmem %s1229_s17, 1 }
 0x163   : > { %p1231_p10 = scmp.ne.s32.totalorder %s1229_s17, %s1230_s0  ;;  %p1236_p6 = scmp.lt.s32.totalorder %s1677_s15, %s1230_s0 }
 0x165   : > { %p1232_p3 = pnand %p1231_p10, %p1630_p2 }
 0x167   : > { %p1233_p5 = pneg %p1232_p3 }
 0x169   : > { %p1238_p7 = pnand %p1236_p6, %p1233_p5 }
 0x16b   : > { %1241 = shalt.err (!%p1238_p7)  }
 0x16c   : > { %s1993_s28 = smov %s1992_s20  ;;  %s498_s18 = sadd.s32 7, %s1638_s14 }
 0x16d   : > { %761 = dma.hbm_to_vmem [thread:$0]  (%p1630_p2), %s475_s12, 16, %s1993_s28, %s1665_s29 }
 0x16e   : > { %s765_s16 = scalar_select %p1630_p2, [#allocation5], [#allocation49] }
 0x16f   : > { %s2021_s18 = smov (!%p1630_p2, %s498_s18), 0  ;;  %s482_s8 = scalar_lea.hbm %s1936_s4, %s1820_s9 }
 0x170   : > { %s647_s1 = scalar_lea.vmem %s1645_s19, 7 [#allocation2]  ;;  %s492_s21 = sshll.u32 %s482_s8, 4  ;;  %s493_s21 = int_to_ptr.hbm [resolvable:$true] %s492_s21 }
 0x171   : > { %s499_s20 = sld [smem:[%s765_s16 + %s2021_s18]]  ;;  %s1242_s17 = sshra.s32 %s493_s21, 4  ;;  %s1243_s17 = int_to_ptr.hbm [resolvable:$true] %s1242_s17 }
 0x172   : > { %s1244_s0 = scalar_lea.hbm %s1243_s17, 1  ;;  %p1249_p0 = scmp.lt.s32.totalorder %s1243_s17, %s1936_s4 }
 0x173   : > { %p1245_p9 = scmp.ne.s32.totalorder %s1243_s17, %s1244_s0  ;;  %p1250_p1 = scmp.lt.s32.totalorder %s1515_s7, %s1244_s0 }
 0x175   : > { %p1246_p11 = pnand %p1245_p9, %p1630_p2  ;;  %p1251_p12 = por %p1250_p1, %p1249_p0 }
 0x177   : > { %p1247_p13 = pneg %p1246_p11 }
 0x179   : > { %p1252_p10 = pnand %p1251_p12, %p1247_p13 }
 0x17b   : > { %1255 = shalt.err (!%p1252_p10)  }
 0x17c   : > { %s1256_s19 = sshra.s32 %s495_s30, 4  ;;  %s1257_s19 = int_to_ptr.vmem [resolvable:$true] %s1256_s19 }
 0x17d   : > { %s1258_s9 = scalar_lea.vmem %s1257_s19, 1 }
 0x17e   : > { %p1259_p3 = scmp.ne.s32.totalorder %s1257_s19, %s1258_s9  ;;  %p1264_p7 = scmp.lt.s32.totalorder %s1677_s15, %s1258_s9 }
 0x180   : > { %p1260_p5 = pnand %p1259_p3, %p1630_p2 }
 0x182   : > { %p1261_p6 = pneg %p1260_p5 }
 0x184   : > { %p1266_p9 = pnand %p1264_p7, %p1261_p6 }
 0x186   : > { %1269 = shalt.err (!%p1266_p9)  }
 0x187   : > { %764 = dma.hbm_to_vmem [thread:$0]  (%p1630_p2), %s493_s21, 16, %s495_s30, %s1665_s29 }
 0x188   : > { %s512_s28 = sshll.u32 %s647_s1, 4  ;;  %s500_s24 = scalar_lea.hbm %s1936_s4, %s499_s20  ;;  %s513_s28 = int_to_ptr.vmem [resolvable:$true] %s512_s28 }
 0x189   : > { %s510_s26 = sshll.u32 %s500_s24, 4  ;;  %s511_s26 = int_to_ptr.hbm [resolvable:$true] %s510_s26 }
 0x18a   : > { %s1270_s8 = sshra.s32 %s511_s26, 4  ;;  %s1271_s8 = int_to_ptr.hbm [resolvable:$true] %s1270_s8 }
 0x18b   : > { %s1272_s17 = scalar_lea.hbm %s1271_s8, 1  ;;  %p1277_p1 = scmp.lt.s32.totalorder %s1271_s8, %s1936_s4 }
 0x18c   : > { %p1273_p11 = scmp.ne.s32.totalorder %s1271_s8, %s1272_s17  ;;  %p1278_p12 = scmp.lt.s32.totalorder %s1515_s7, %s1272_s17 }
 0x18e   : > { %p1274_p13 = pnand %p1273_p11, %p1630_p2  ;;  %p1279_p10 = por %p1278_p12, %p1277_p1 }
 0x190   : > { %p1275_p0 = pneg %p1274_p13 }
 0x192   : > { %p1280_p3 = pnand %p1279_p10, %p1275_p0 }
 0x194   : > { %1283 = shalt.err (!%p1280_p3)  }
 0x195   : > { %s1284_s30 = sshra.s32 %s513_s28, 4  ;;  %s1285_s30 = int_to_ptr.vmem [resolvable:$true] %s1284_s30 }
 0x196   : > { %s1286_s1 = scalar_lea.vmem %s1285_s30, 1 }
 0x197   : > { %p1287_p5 = scmp.ne.s32.totalorder %s1285_s30, %s1286_s1  ;;  %p1292_p9 = scmp.lt.s32.totalorder %s1677_s15, %s1286_s1 }
 0x199   : > { %p1288_p6 = pnand %p1287_p5, %p1630_p2 }
 0x19b   : > { %p1289_p7 = pneg %p1288_p6 }
 0x19d   : > { %p1294_p11 = pnand %p1292_p9, %p1289_p7 }
 0x19f   : > { %1297 = shalt.err (!%p1294_p11)  }
 0x1a0   : > { %767 = dma.hbm_to_vmem [thread:$0]  (%p1630_p2), %s511_s26, 16, %s513_s28, %s1665_s29  ;;  %v836_v3 = vld [vmem:[%s1934_s2 + $0x1] ss:$0 sm:$0xff]  ;;  %v837_v4 = vld [vmem:[%s1934_s2] ss:$0 sm:$0xff]  ;;  %v523_v6 = vpop.permute.xlu0 %522 }
 0x1a1   : > { %v528_v5 = vld [vmem:[%s1935_s3] sm:$0xff]  ;;  %vm524_vm1 = vcmp.eq.s32.totalorder %v523_v6, 1  ;;  %s206_s10 = scalar_lea.vmem [#allocation6], %s1484_s11  ;;  %s1994_s15 = sshll.u32 %s2007_s13, 3 }
 0x1a2   : > { %v527_v7 = vsel %vm524_vm1, %v836_v3, %v837_v4  ;;  %s531_s18 = scalar_lea.vmem [#allocation2], %s1994_s15  ;;  %s532_s29 = scalar_lea.sflag [#allocation3], %s2007_s13 }
 0x1a3   : > { %v529_v8 = vadd.f32 %v528_v5, %v527_v7 }
 0x1a4   : > { %1352 = dma.done.wait %s532_s29, 128 }
 0x1a5   : > { %1353 = vsyncadd %s532_s29, 4294967168  ;;  %s1995_s28 = sshll.u32 %s1372_s25, 3  ;;  %s553_s8 = sshll.u32 %s206_s10, 4  ;;  %v536_v9 = vld [vmem:[%s531_s18] sm:$0xff]  ;;  %s554_s8 = int_to_ptr.vmem [resolvable:$true] %s553_s8 }
 0x1a6   : > { %s551_s26 = scalar_lea.hbm %s1937_s5, %s1995_s28  ;;  %v537_v10 = vadd.f32 %v536_v9, %v529_v8  ;;  %s1996_s11 = sand.u32 1, %s1364_s23  }
 0x1a7   : > { %s555_s17 = sshll.u32 %s551_s26, 4  ;;  %s540_s0 = scalar_lea.sflag [#allocation7], %s1996_s11  ;;  %s556_s17 = int_to_ptr.hbm [resolvable:$true] %s555_s17 }
 0x1a8   : > { %538 = vst [vmem:[%s206_s10] sm:$0xff] %v537_v10  ;;  %s1312_s13 = sshra.s32 %s556_s17, 4  ;;  %s1318_s1 = scalar_lea.hbm %s1937_s5, 16  ;;  %s1313_s13 = int_to_ptr.hbm [resolvable:$true] %s1312_s13 }
 0x1a9   : > { %s1314_s14 = scalar_lea.hbm %s1313_s13, 8  ;;  %p1319_p1 = scmp.lt.s32.totalorder %s1313_s13, %s1937_s5 }
 0x1aa   : > { %p1315_p2 = scmp.ne.s32.totalorder %s1313_s13, %s1314_s14  ;;  %p1320_p12 = scmp.lt.s32.totalorder %s1318_s1, %s1314_s14 }
 0x1ac   : > { %p1316_p13 = pnand %p1315_p2, %p1465_p4  ;;  %p1321_p10 = por %p1320_p12, %p1319_p1 }
 0x1ae   : > { %p1317_p0 = pneg %p1316_p13 }
 0x1b0   : > { %p1322_p3 = pnand %p1321_p10, %p1317_p0 }
 0x1b2   : > { %1325 = shalt.err (!%p1322_p3)
}
 0x1b3   : > { %768 = dma.vmem_to_hbm [thread:$0]  (%p1465_p4), %s554_s8, 128, %s556_s17, %s540_s0  }
 0x1b4 PF: > { %p776_p5 = scmp.ge.s32.totalorder %s1380_s27, 2  ;;  %s567_s12 = sand.u32 1, %s1360_s22  }
 0x1b5   : > { %s568_s19 = scalar_lea.sflag [#allocation7], %s567_s12 }
 0x1b6   : > { %p771_p6 = pnand %p776_p5, %p1472_p8 }
 0x1b8   : > { %p772_p7 = pneg %p771_p6 }
 0x1ba   : > { %1355 = dma.done.wait (%p772_p7), %s568_s19, 128  }
 0x1bb   : > { %1357 = vsyncadd (%p772_p7), %s568_s19, 4294967168  ;;  %s26_s27 = sadd.s32 1, %s1380_s27   ;;  %s1998_s9 = sld [smem:[#allocation53_spill]] }
 0x1bc   : > { %p23_p9 = scmp.ge.s32.totalorder %s26_s27, 4   ;;  %s1999_s24 = sld [smem:[#allocation57_spill]] }
 0x1bd   : > { %s2000_s25 = sld [smem:[#allocation54_spill]]  ;;  %s2002_s22 = smov %s1364_s23 }
 0x1be   : > { %s2001_s26 = sld [smem:[#allocation55_spill]]  ;;  %25 = sbr.rel (!%p23_p9) target bundleno = 10 (0xa), region = 177 }
 0x1c1   : > { %s2003_s23 = smov %s1998_s9 }
 0x1c3   :  { %574 = vsyncpa [#allocation7], 1 }
 0x1c4   :  { %576 = vsyncpa [#allocation7 + $0x1], 1 }
 0x1c5   :  { %577 = vsyncmov [#allocation3] }
 0x1c8   :  { %s578_s6 = vpop.sfrf %577 }
 0x1c9   :  { %p730_p4 = scmp.ne.s32.totalorder %s578_s6, 0 }
 0x1cb   :  { %582 = shalt.err (%p730_p4)  }
 0x1cc   :  { %584 = vsyncmov [#allocation3 + $0x1] }
 0x1cf   :  { %s585_s10 = vpop.sfrf %584 }
 0x1d0   :  { %p731_p8 = scmp.ne.s32.totalorder %s585_s10, 0 }
 0x1d2   :  { %589 = shalt.err (%p731_p8)  }

</bundles_post_ra>
